<compile_context>
chip_gen: v7x
topology: tpu7x:2x2x1
jax: 0.10.0
libtpu: 0.0.40
codegen_flags: <defaults>
</compile_context>

<pallas_src>
import jax
import jax.numpy as jnp
from jax.experimental import pallas as pl
from jax.experimental.pallas import tpu as pltpu


def _round_up(x, m):
    return ((x + m - 1) // m) * m


def _sublane(dtype):
    # Sublane packing of the second-to-last dim: 8 for 4B, 16 for 2B, 32 for 1B.
    return {4: 8, 2: 16, 1: 32}.get(jnp.dtype(dtype).itemsize, 8)


def _vmem_capacity_bytes():
    """Physical VMEM per TensorCore; conservative 64 MiB (v7x) fallback."""
    try:
        info = pltpu.get_tpu_info()
        cap = getattr(info, "vmem_capacity_bytes", None)
        if cap:
            return int(cap)
    except Exception:
        pass
    return 64 << 20


def mlp_feat_kernel(x_ref, w1_ref, b1_ref, w2_ref, b2_ref, o_ref, acc_ref):
    """Grid = (batch_tiles, out_tiles, hidden_tiles).  Axis 2 is the
    contraction over hidden for the second matmul; the f32 accumulator lives
    in VMEM scratch and is initialized / finalized with pl.when."""
    k = pl.program_id(2)

    @pl.when(k == 0)
    def _():
        acc_ref[...] = jnp.zeros_like(acc_ref)

    # First linear (current hidden chunk only) + bias + ReLU.
    h = jnp.dot(x_ref[...], w1_ref[...], preferred_element_type=jnp.float32)
    h = jnp.maximum(h + b1_ref[...], 0.0)

    # Second linear: accumulate this hidden chunk's contribution for the
    # current output-column tile.
    acc_ref[...] += jnp.dot(h.astype(w2_ref.dtype), w2_ref[...],
                            preferred_element_type=jnp.float32)

    @pl.when(k == pl.num_programs(2) - 1)
    def _():
        o_ref[...] = (acc_ref[...] + b2_ref[...]).astype(o_ref.dtype)


def mlp_feat(x, w1_t, b1, w2_t, b2, *, tile_b=None, tile_h=None, tile_n=None,
             mxu_dtype=None):
    """x: (B, in);  w1_t: (in, hidden);  b1: (hidden,);
    w2_t: (hidden, out);  b2: (out,).  Returns (B, out).

    mxu_dtype: optional matmul-operand dtype (e.g. jnp.bfloat16) for the
    v6e/v7x MXU fast path; accumulation stays float32."""
    B, in_dim = x.shape
    hidden = w1_t.shape[1]
    out_dim = w2_t.shape[1]
    dtype = x.dtype
    sub = max(_sublane(dtype), _sublane(mxu_dtype) if mxu_dtype is not None else 0)

    # --- padded extents (lane / sublane alignment) -------------------------
    in_pad = _round_up(in_dim, 128)            # lane-dense x loads, full MXU K
    h128 = _round_up(hidden, 128)
    o128 = _round_up(out_dim, 128)

    # --- VMEM budget (generation-aware) ------------------------------------
    vmem_budget = int(0.80 * _vmem_capacity_bytes())

    w_it = jnp.dtype(mxu_dtype).itemsize if mxu_dtype is not None \
        else jnp.dtype(w1_t.dtype).itemsize
    x_it = w_it                                  # x is cast alongside weights
    o_it = jnp.dtype(dtype).itemsize
    weight_bytes = (in_pad * h128 + h128 * o128) * w_it
    weights_fit_resident = weight_bytes <= int(0.45 * vmem_budget)

    # --- tile sizing --------------------------------------------------------
    if tile_h is None:
        # Resident weights when they fit (single k step -> W1/W2 DMA'd once).
        tile_h = h128 if weights_fit_resident else min(512, h128)
    tile_h = max(128, min(_round_up(tile_h, 128), h128))

    if tile_n is None:
        tile_n = o128 if (weights_fit_resident or o128 <= 512) else 512
    tile_n = max(128, min(_round_up(tile_n, 128), o128))

    weights_resident = (tile_h >= h128) and (tile_n >= o128)
    if tile_b is None:
        # Larger batch tiles when weights stream (more flops per weight byte).
        tile_b = 256 if weights_resident else 512
        tile_b = min(tile_b, _round_up(B, sub))
    tile_b = max(sub, _round_up(tile_b, sub))

    # Double-buffered per-step footprint + f32 accumulator scratch.
    def _est(tb, th, tn):
        per = (tb * in_pad * x_it          # x tile
               + in_pad * th * w_it        # W1 tile
               + th * 4                    # b1 tile (f32)
               + th * tn * w_it            # W2 tile
               + tn * 4                    # b2 tile (f32)
               + tb * tn * o_it)           # out tile
        return 2 * per + tb * tn * 4       # 2x buffering + accumulator

    # Shrink tiles until the footprint fits the generation's VMEM budget.
    while _est(tile_b, tile_h, tile_n) > vmem_budget:
        if tile_h > 128:
            tile_h = max(128, (tile_h // 2) // 128 * 128)
        elif tile_n > 128:
            tile_n = max(128, (tile_n // 2) // 128 * 128)
        elif tile_b > sub:
            tile_b = max(sub, (tile_b // 2) // sub * sub)
        else:
            break

    b_pad = _round_up(B, tile_b)
    h_pad = _round_up(hidden, tile_h)
    out_pad = _round_up(out_dim, tile_n)

    # --- zero padding (semantics-preserving) --------------------------------
    # Padded in cols multiply zero W1 rows; padded hidden cols give relu(0)=0
    # and multiply zero W2 rows; padded batch rows / out cols are sliced off.
    x_p = jnp.pad(x, ((0, b_pad - B), (0, in_pad - in_dim)))
    w1_p = jnp.pad(w1_t, ((0, in_pad - in_dim), (0, h_pad - hidden)))
    b1_p = jnp.pad(b1, (0, h_pad - hidden)).reshape(1, h_pad)
    w2_p = jnp.pad(w2_t, ((0, h_pad - hidden), (0, out_pad - out_dim)))
    b2_p = jnp.pad(b2, (0, out_pad - out_dim)).reshape(1, out_pad)

    if mxu_dtype is not None:
        # bf16 (or fp8) MXU operands; biases + accumulation stay f32.
        x_p = x_p.astype(mxu_dtype)
        w1_p = w1_p.astype(mxu_dtype)
        w2_p = w2_p.astype(mxu_dtype)

    grid = (b_pad // tile_b, out_pad // tile_n, h_pad // tile_h)

    est = _est(tile_b, tile_h, tile_n)
    vmem_limit = int(max(min(est + (8 << 20), vmem_budget), 32 << 20))

    # Advisory cost estimate so XLA schedules neighbors around the call.
    flops = 2 * b_pad * (in_pad * h_pad + h_pad * out_pad)
    bytes_accessed = int(x_p.size * x_p.dtype.itemsize
                         + w1_p.size * w1_p.dtype.itemsize
                         + b1_p.size * b1_p.dtype.itemsize
                         + w2_p.size * w2_p.dtype.itemsize
                         + b2_p.size * b2_p.dtype.itemsize
                         + b_pad * out_pad * o_it)
    cost = pl.CostEstimate(flops=int(flops), transcendentals=0,
                           bytes_accessed=bytes_accessed)

    out = pl.pallas_call(
        mlp_feat_kernel,
        out_shape=jax.ShapeDtypeStruct((b_pad, out_pad), dtype),
        grid_spec=pltpu.PrefetchScalarGridSpec(
            num_scalar_prefetch=0,
            grid=grid,
            in_specs=[
                pl.BlockSpec((tile_b, in_pad), lambda i, j, k: (i, 0)),
                pl.BlockSpec((in_pad, tile_h), lambda i, j, k: (0, k)),
                pl.BlockSpec((1, tile_h), lambda i, j, k: (0, k)),
                pl.BlockSpec((tile_h, tile_n), lambda i, j, k: (k, j)),
                pl.BlockSpec((1, tile_n), lambda i, j, k: (0, j)),
            ],
            out_specs=pl.BlockSpec((tile_b, tile_n), lambda i, j, k: (i, j)),
            scratch_shapes=[pltpu.VMEM((tile_b, tile_n), jnp.float32)],
        ),
        compiler_params=pltpu.CompilerParams(
            dimension_semantics=("parallel", "parallel", "arbitrary"),
            vmem_limit_bytes=vmem_limit),
        cost_estimate=cost,
    )(x_p, w1_p, b1_p, w2_p, b2_p)

    return out[:B, :out_dim]


def init_params(key, input_size, hidden_size, output_size, dtype=jnp.float32):
    """Deterministic init mimicking nn.Linear default (uniform +/- 1/sqrt(fan_in))."""
    k1, k2, k3, k4 = jax.random.split(key, 4)
    lim1 = 1.0 / (input_size ** 0.5)
    lim2 = 1.0 / (hidden_size ** 0.5)
    # PyTorch stores W as (out, in); keep that convention, transpose for the kernel.
    w1 = jax.random.uniform(k1, (hidden_size, input_size), dtype, -lim1, lim1)
    b1 = jax.random.uniform(k2, (hidden_size,), dtype, -lim1, lim1)
    w2 = jax.random.uniform(k3, (output_size, hidden_size), dtype, -lim2, lim2)
    b2 = jax.random.uniform(k4, (output_size,), dtype, -lim2, lim2)
    return w1, b1, w2, b2


def _ref(x, w1, b1, w2, b2):
    return jnp.maximum(x @ w1.T + b1, 0.0) @ w2.T + b2


if __name__ == "__main__":
    key = jax.random.PRNGKey(0)
    k1, k2, k3, k4 = jax.random.split(key, 4)

    # Case 1: toy shape, defaults (weights resident, single grid step,
    # exercises in/hidden/out lane padding).
    batch, input_size, hidden_size, output_size = 8, 32, 64, 16
    x = jax.random.normal(k1, (batch, input_size), jnp.float32)
    w1, b1, w2, b2 = init_params(k2, input_size, hidden_size, output_size)
    out = jax.block_until_ready(mlp_feat(x, w1.T, b1, w2.T, b2))
    ref = _ref(x, w1, b1, w2, b2)
    assert out.shape == (batch, output_size)
    assert jnp.allclose(out, ref, atol=1e-5, rtol=1e-5)

    # Case 2: non-aligned shapes + explicit small tiles so all three grid axes
    # (batch, out, hidden-contraction) have multiple steps; exercises batch /
    # in_dim padding, the accumulator init/finalize, and out_pad tiling.
    batch2, in2, hid2, out2 = 20, 48, 256, 200
    x2 = jax.random.normal(k3, (batch2, in2), jnp.float32)
    w1b, b1b, w2b, b2b = init_params(k4, in2, hid2, out2)
    out_2 = jax.block_until_ready(
        mlp_feat(x2, w1b.T, b1b, w2b.T, b2b, tile_b=8, tile_h=128, tile_n=128))
    ref_2 = _ref(x2, w1b, b1b, w2b, b2b)
    assert out_2.shape == (batch2, out2)
    assert jnp.allclose(out_2, ref_2, atol=1e-4, rtol=1e-4)

    # Case 3: bf16 MXU-operand fast path (v6e/v7x), f32 accumulation,
    # looser tolerance against the f32 reference.
    out_3 = jax.block_until_ready(
        mlp_feat(x, w1.T, b1, w2.T, b2, mxu_dtype=jnp.bfloat16))
    assert out_3.shape == (batch, output_size)
    assert jnp.allclose(out_3, ref, atol=5e-2, rtol=5e-2)

    print("KERNEL_OK")
</pallas_src>

<mosaic_0001>
module attributes {stable_mosaic.version = 11 : i64} {
  func.func @mlp_feat_kernel(%arg0: i32, %arg1: i32, %arg2: i32, %arg3: memref<8x128xf32, #tpu.memory_space<vmem>>, %arg4: memref<128x128xf32, #tpu.memory_space<vmem>>, %arg5: memref<1x128xf32, #tpu.memory_space<vmem>>, %arg6: memref<128x128xf32, #tpu.memory_space<vmem>>, %arg7: memref<1x128xf32, #tpu.memory_space<vmem>>, %arg8: memref<8x128xf32, #tpu.memory_space<vmem>>, %arg9: memref<8x128xf32, #tpu.memory_space<vmem>>) attributes {dimension_semantics = [#tpu.dimension_semantics<parallel>, #tpu.dimension_semantics<parallel>, #tpu.dimension_semantics<arbitrary>], iteration_bounds = array<i64: 1, 1, 1>, scalar_prefetch = 0 : i64, scratch_operands = 1 : i64, tpu.core_type = #tpu.core_type<tc>, window_params = [{transform_indices = @transform_0, window_bounds = array<i64: 8, 128>}, {transform_indices = @transform_1, window_bounds = array<i64: 128, 128>}, {transform_indices = @transform_2, window_bounds = array<i64: 1, 128>}, {transform_indices = @transform_3, window_bounds = array<i64: 128, 128>}, {transform_indices = @transform_4, window_bounds = array<i64: 1, 128>}, {transform_indices = @transform_5, window_bounds = array<i64: 8, 128>}]} {
    %c0_i32 = arith.constant 0 : i32
    %0 = arith.cmpi eq, %arg2, %c0_i32 : i32
    %1 = arith.extui %0 : i1 to i32
    %c0_i32_0 = arith.constant 0 : i32
    %2 = arith.cmpi ne, %1, %c0_i32_0 : i32
    scf.if %2 {
      %cst_16 = arith.constant 0.000000e+00 : f32
      %19 = vector.broadcast %cst_16 : f32 to vector<8x128xf32>
      %c0_17 = arith.constant 0 : index
      %c0_18 = arith.constant 0 : index
      %20 = vector.load %arg9[%c0_17, %c0_18] : memref<8x128xf32, #tpu.memory_space<vmem>>, vector<8x128xf32>
      tpu.vector_store %arg9[%c0_17, %c0_18], %19 {strides = array<i32>} : memref<8x128xf32, #tpu.memory_space<vmem>>, vector<8x128xf32>,
    } else {
    }
    %c0 = arith.constant 0 : index
    %c0_1 = arith.constant 0 : index
    %3 = vector.load %arg3[%c0, %c0_1] : memref<8x128xf32, #tpu.memory_space<vmem>>, vector<8x128xf32>
    %c0_2 = arith.constant 0 : index
    %c0_3 = arith.constant 0 : index
    %4 = vector.load %arg4[%c0_2, %c0_3] : memref<128x128xf32, #tpu.memory_space<vmem>>, vector<128x128xf32>
    %cst = arith.constant dense<0.000000e+00> : vector<8x128xf32>
    %5 = tpu.matmul %3, %4, %cst {dimension_numbers = #tpu.dot_dimension_numbers<[1], [0], [0], [1], [0, 0, 1, 1], [], []>} : vector<8x128xf32>, vector<128x128xf32>, vector<8x128xf32> -> vector<8x128xf32>
    %c0_4 = arith.constant 0 : index
    %c0_5 = arith.constant 0 : index
    %6 = vector.load %arg5[%c0_4, %c0_5] : memref<1x128xf32, #tpu.memory_space<vmem>>, vector<1x128xf32>
    %7 = vector.broadcast %6 : vector<1x128xf32> to vector<8x128xf32>
    %8 = arith.addf %5, %7 : vector<8x128xf32>
    %cst_6 = arith.constant 0.000000e+00 : f32
    %9 = vector.broadcast %cst_6 : f32 to vector<8x128xf32>
    %10 = arith.maximumf %8, %9 : vector<8x128xf32>
    %c0_7 = arith.constant 0 : index
    %c0_8 = arith.constant 0 : index
    %11 = vector.load %arg9[%c0_7, %c0_8] : memref<8x128xf32, #tpu.memory_space<vmem>>, vector<8x128xf32>
    %c0_9 = arith.constant 0 : index
    %c0_10 = arith.constant 0 : index
    %12 = vector.load %arg6[%c0_9, %c0_10] : memref<128x128xf32, #tpu.memory_space<vmem>>, vector<128x128xf32>
    %cst_11 = arith.constant dense<0.000000e+00> : vector<8x128xf32>
    %13 = tpu.matmul %10, %12, %cst_11 {dimension_numbers = #tpu.dot_dimension_numbers<[1], [0], [0], [1], [0, 0, 1, 1], [], []>} : vector<8x128xf32>, vector<128x128xf32>, vector<8x128xf32> -> vector<8x128xf32>
    %14 = arith.addf %11, %13 : vector<8x128xf32>
    %c0_12 = arith.constant 0 : index
    %c0_13 = arith.constant 0 : index
    %15 = vector.load %arg9[%c0_12, %c0_13] : memref<8x128xf32, #tpu.memory_space<vmem>>, vector<8x128xf32>
    tpu.vector_store %arg9[%c0_12, %c0_13], %14 {strides = array<i32>} : memref<8x128xf32, #tpu.memory_space<vmem>>, vector<8x128xf32>,
    %c0_i32_14 = arith.constant 0 : i32
    %16 = arith.cmpi eq, %arg2, %c0_i32_14 : i32
    %17 = arith.extui %16 : i1 to i32
    %c0_i32_15 = arith.constant 0 : i32
    %18 = arith.cmpi ne, %17, %c0_i32_15 : i32
    scf.if %18 {
      %c0_16 = arith.constant 0 : index
      %c0_17 = arith.constant 0 : index
      %19 = vector.load %arg9[%c0_16, %c0_17] : memref<8x128xf32, #tpu.memory_space<vmem>>, vector<8x128xf32>
      %c0_18 = arith.constant 0 : index
      %c0_19 = arith.constant 0 : index
      %20 = vector.load %arg7[%c0_18, %c0_19] : memref<1x128xf32, #tpu.memory_space<vmem>>, vector<1x128xf32>
      %21 = vector.broadcast %20 : vector<1x128xf32> to vector<8x128xf32>
      %22 = arith.addf %19, %21 : vector<8x128xf32>
      %c0_20 = arith.constant 0 : index
      %c0_21 = arith.constant 0 : index
      %23 = vector.load %arg8[%c0_20, %c0_21] : memref<8x128xf32, #tpu.memory_space<vmem>>, vector<8x128xf32>
      tpu.vector_store %arg8[%c0_20, %c0_21], %22 {strides = array<i32>} : memref<8x128xf32, #tpu.memory_space<vmem>>, vector<8x128xf32>,
    } else {
    }
    return
  }
  func.func @transform_0(%arg0: i32, %arg1: i32, %arg2: i32) -> (i32, i32) {
    %c0_i32 = arith.constant 0 : i32
    %c0_i32_0 = arith.constant 0 : i32
    return %arg0, %c0_i32 : i32, i32
  }
  func.func @transform_1(%arg0: i32, %arg1: i32, %arg2: i32) -> (i32, i32) {
    %c0_i32 = arith.constant 0 : i32
    %c0_i32_0 = arith.constant 0 : i32
    return %c0_i32, %arg2 : i32, i32
  }
  func.func @transform_2(%arg0: i32, %arg1: i32, %arg2: i32) -> (i32, i32) {
    %c0_i32 = arith.constant 0 : i32
    %c0_i32_0 = arith.constant 0 : i32
    return %c0_i32, %arg2 : i32, i32
  }
  func.func @transform_3(%arg0: i32, %arg1: i32, %arg2: i32) -> (i32, i32) {
    %c0_i32 = arith.constant 0 : i32
    return %arg2, %arg1 : i32, i32
  }
  func.func @transform_4(%arg0: i32, %arg1: i32, %arg2: i32) -> (i32, i32) {
    %c0_i32 = arith.constant 0 : i32
    %c0_i32_0 = arith.constant 0 : i32
    return %c0_i32, %arg1 : i32, i32
  }
  func.func @transform_5(%arg0: i32, %arg1: i32, %arg2: i32) -> (i32, i32) {
    %c0_i32 = arith.constant 0 : i32
    return %arg0, %arg1 : i32, i32
  }
}

</mosaic_0001>

<bundles_post_ra>
// kernel: tpu_custom_call.1
= control target key start
LH: loop header
LB: loop body
LE: loop exit
PB: predicated region body
PF: predicated region fallthrough
CT: control target
= control target key end

     0   :  { %10 = vsyncpa [#allocation4], 0  ;;  %s650_s0 = inlined_call_operand.hbm [shape: f32[8,128], index: 0, kind: input, shape index: {}]   ;;  %s651_s1 = inlined_call_operand.hbm [shape: f32[128,128], index: 1, kind: input, shape index: {}]   ;;  %s652_s2 = inlined_call_operand.vmem [shape: f32[1,128], index: 2, kind: input, shape index: {}]   ;;  %s653_s3 = inlined_call_operand.hbm [shape: f32[128,128], index: 3, kind: input, shape index: {}]   ;;  %s654_s4 = inlined_call_operand.vmem [shape: f32[1,128], index: 4, kind: input, shape index: {}]   ;;  %s655_s5 = inlined_call_operand.hbm [shape: f32[8,128], index: 5, kind: output, shape index: {}]  }
   0x1   :  { %11 = vsyncpa [#allocation7], 0 }
   0x2   :  { %12 = vsyncpa [#allocation5], 0  ;;  %s535_s18 = smov [#allocation6]   ;;  %s441_s22 = scalar_lea.hbm %s651_s1, 2048 }
   0x3   :  { %s28_s19 = sshll.u32 %s535_s18, 4  ;;  %p442_p0 = scmp.ne.s32.totalorder %s651_s1, %s441_s22  ;;  %s29_s19 = int_to_ptr.vmem [resolvable:$true] %s28_s19 }
   0x4   :  { %p445_p1 = scmp.lt.u32.totalorder %s441_s22, %s651_s1 }
   0x6   :  { %p447_p2 = pnand %p445_p1, %p442_p0 }
   0x8   :  { %450 = shalt.err (!%p447_p2)
}
   0x9   :  { %s451_s27 = scalar_lea.vmem %s29_s19, 2048  ;;  %p456_p4 = scmp.lt.s32.totalorder %s29_s19, %s29_s19 }
   0xa   :  { %p452_p3 = scmp.ne.s32.totalorder %s29_s19, %s451_s27  ;;  %p457_p5 = scmp.lt.s32.totalorder %s451_s27, %s451_s27 }
   0xc   :  { %p458_p6 = por %p457_p5, %p456_p4 }
   0xe   :  { %p459_p7 = pnand %p458_p6, %p452_p3 }
  0x10   :  { %462 = shalt.err (!%p459_p7)
}
  0x11   :  { %s536_s28 = smov 128   ;;  %s537_s29 = smov 8  }
  0x12   :  { %34 = dma.hbm_to_vmem [thread:$0]  %s651_s1, 2048, %s29_s19, [#allocation7], %s536_s28, %s536_s28, %s537_s29  }
  0x13   :  { %s538_s7 = smov [#allocation3]   ;;  %s539_s9 = smov [#allocation8]  }
  0x14   :  { %s19_s8 = sshll.u32 %s538_s7, 4  ;;  %s42_s10 = sshll.u32 %s539_s9, 4  ;;  %s20_s8 = int_to_ptr.vmem [resolvable:$true] %s19_s8  ;;  %s43_s10 = int_to_ptr.vmem [resolvable:$true] %s42_s10 }
  0x15   :  { %s463_s13 = scalar_lea.hbm %s650_s0, 128 }
  0x16   :  { %p464_p8 = scmp.ne.s32.totalorder %s650_s0, %s463_s13  ;;  %p467_p9 = scmp.lt.u32.totalorder %s463_s13, %s650_s0 }
  0x18   :  { %p469_p10 = pnand %p467_p9, %p464_p8 }
  0x1a   :  { %472 = shalt.err (!%p469_p10)
}
  0x1b   :  { %s473_s1 = scalar_lea.vmem %s20_s8, 128  ;;  %p478_p12 = scmp.lt.s32.totalorder %s20_s8, %s20_s8 }
  0x1c   :  { %p474_p11 = scmp.ne.s32.totalorder %s20_s8, %s473_s1  ;;  %p479_p13 = scmp.lt.s32.totalorder %s473_s1, %s473_s1 }
  0x1e   :  { %p480_p0 = por %p479_p13, %p478_p12 }
  0x20   :  { %p481_p1 = pnand %p480_p0, %p474_p11 }
  0x22   :  { %484 = shalt.err (!%p481_p1)
}
  0x23   :  { %22 = dma.hbm_to_vmem [thread:$0]  %s650_s0, 128, %s20_s8, [#allocation4]  }
  0x24   :  { %s485_s22 = scalar_lea.hbm %s653_s3, 2048 }
  0x25   :  { %p486_p2 = scmp.ne.s32.totalorder %s653_s3, %s485_s22  ;;  %p489_p3 = scmp.lt.u32.totalorder %s485_s22, %s653_s3 }
  0x27   :  { %p491_p4 = pnand %p489_p3, %p486_p2 }
  0x29   :  { %494 = shalt.err (!%p491_p4)
}
  0x2a   :  { %s495_s27 = scalar_lea.vmem %s43_s10, 2048  ;;  %p500_p6 = scmp.lt.s32.totalorder %s43_s10, %s43_s10 }
  0x2b   :  { %p496_p5 = scmp.ne.s32.totalorder %s43_s10, %s495_s27  ;;  %p501_p7 = scmp.lt.s32.totalorder %s495_s27, %s495_s27 }
  0x2d   :  { %p502_p8 = por %p501_p7, %p500_p6 }
  0x2f   :  { %p503_p9 = pnand %p502_p8, %p496_p5 }
  0x31   :  { %506 = shalt.err (!%p503_p9)
}
  0x32   :  { %48 = dma.hbm_to_vmem [thread:$0]  %s653_s3, 2048, %s43_s10, [#allocation7], %s536_s28, %s536_s28, %s537_s29  }
  0x33   :  { %529 = dma.done.wait [#allocation4], 128  }
  0x34   :  { %530 = vsyncadd [#allocation4], 4294967168 }
  0x35   :  { %531 = dma.done.wait [#allocation7], 4096  }
  0x36   :  { %532 = vsyncadd [#allocation7], 4294963200  ;;  %v540_v0 = vmov 0.0|0.0   ;;  %vm541_vm0 = vmmov 0   ;;  %v542_v1 = vmov 0.0   ;;  %v66_v2 = vld [vmem:[#allocation6] sm:$0xff] }
  0x37   :  { %384 = vmatprep.subr.bf16.mxu0 %v540_v0  ;;  %346 = vmatprep.mubr.msk.f32.mxu0 %vm541_vm0, %v542_v1  ;;  %v67_v3 = vld [vmem:[#allocation6 + $0x8] sm:$0xff]  ;;  %v68_v4 = vld [vmem:[#allocation6 + $0x10] sm:$0xff]  ;;  %v69_v6 = vld [vmem:[#allocation6 + $0x18] sm:$0xff]  ;;  %s543_s7 = smov [#allocation9]  }
  0x38   :  { %408 = vmatprep.subr.bf16.mxu1 %v540_v0  ;;  %381 = vmatprep.mubr.msk.f32.mxu1 %vm541_vm0, %v542_v1  ;;  %v385_v5 = vpack.c.bf16 %v67_v3, %v66_v2  ;;  %v388_v7 = vpack.c.bf16 %v69_v6, %v68_v4  ;;  %v70_v8 = vld [vmem:[#allocation6 + $0x20] sm:$0xff]  ;;  %v71_v9 = vld [vmem:[#allocation6 + $0x28] sm:$0xff]  ;;  %v163_v12 = vld [vmem:[#allocation8 + $0x10] sm:$0xff]  ;;  %s268_s8 = sshll.u32 %s543_s7, 4  ;;  %s269_s8 = int_to_ptr.vmem [resolvable:$true] %s268_s8 }
  0x39   :  { %v161_v10 = vld [vmem:[#allocation8] sm:$0xff]  ;;  %v162_v11 = vld [vmem:[#allocation8 + $0x8] sm:$0xff]  ;;  %v164_v13 = vld [vmem:[#allocation8 + $0x18] sm:$0xff]  ;;  %v391_v14 = vpack.c.bf16 %v71_v9, %v70_v8  ;;  %s507_s9 = scalar_lea.vmem %s269_s8, 128  ;;  %p512_p11 = scmp.lt.s32.totalorder %s269_s8, %s269_s8 }
  0x3a   :  { %386 = vmatpush3.bf16.msra.mxu0 %v385_v5  ;;  %v409_v15 = vpack.c.bf16 %v162_v11, %v161_v10  ;;  %v72_v16 = vld [vmem:[#allocation6 + $0x30] sm:$0xff]  ;;  %v73_v17 = vld [vmem:[#allocation6 + $0x38] sm:$0xff]  ;;  %v412_v18 = vpack.c.bf16 %v164_v13, %v163_v12  ;;  %v165_v19 = vld [vmem:[#allocation8 + $0x20] sm:$0xff]  ;;  %p508_p10 = scmp.ne.s32.totalorder %s269_s8, %s507_s9  ;;  %p513_p12 = scmp.lt.s32.totalorder %s507_s9, %s507_s9 }
  0x3b   :  { %387 = vmatprep.subr.bf16.mxu0 %v540_v0  ;;  %v166_v20 = vld [vmem:[#allocation8 + $0x28] sm:$0xff]  ;;  %v394_v21 = vpack.c.bf16 %v73_v17, %v72_v16  ;;  %v74_v22 = vld [vmem:[#allocation6 + $0x40] sm:$0xff]  ;;  %v167_v25 = vld [vmem:[#allocation8 + $0x30] sm:$0xff] }
  0x3c   :  { %410 = vmatpush3.bf16.msra.mxu1 %v409_v15  ;;  %v75_v23 = vld [vmem:[#allocation6 + $0x48] sm:$0xff]  ;;  %v415_v24 = vpack.c.bf16 %v166_v20, %v165_v19  ;;  %v168_v26 = vld [vmem:[#allocation8 + $0x38] sm:$0xff]  ;;  %v76_v28 = vld [vmem:[#allocation6 + $0x50] sm:$0xff]  ;;  %p514_p13 = por %p513_p12, %p512_p11 }
  0x3d   :  { %411 = vmatprep.subr.bf16.mxu1 %v540_v0  ;;  %v397_v27 = vpack.c.bf16 %v75_v23, %v74_v22  ;;  %v77_v29 = vld [vmem:[#allocation6 + $0x58] sm:$0xff]  ;;  %v418_v30 = vpack.c.bf16 %v168_v26, %v167_v25  ;;  %v169_v31 = vld [vmem:[#allocation8 + $0x40] sm:$0xff]  ;;  %v170_v32 = vld [vmem:[#allocation8 + $0x48] sm:$0xff] }
  0x3e   :  { %389 = vmatpush3.bf16.msra.mxu0 %v388_v7  ;;  %v400_v33 = vpack.c.bf16 %v77_v29, %v76_v28  ;;  %v78_v34 = vld [vmem:[#allocation6 + $0x60] sm:$0xff]  ;;  %v79_v35 = vld [vmem:[#allocation6 + $0x68] sm:$0xff]  ;;  %v421_v36 = vpack.c.bf16 %v170_v32, %v169_v31  ;;  %v171_v37 = vld [vmem:[#allocation8 + $0x50] sm:$0xff]  ;;  %p515_p0 = pnand %p514_p13, %p508_p10 }
  0x3f   :  { %390 = vmatprep.subr.bf16.mxu0 %v540_v0  ;;  %v172_v38 = vld [vmem:[#allocation8 + $0x58] sm:$0xff]  ;;  %v403_v39 = vpack.c.bf16 %v79_v35, %v78_v34  ;;  %v80_v40 = vld [vmem:[#allocation6 + $0x70] sm:$0xff]  ;;  %v173_v43 = vld [vmem:[#allocation8 + $0x60] sm:$0xff] }
  0x40   :  { %413 = vmatpush3.bf16.msra.mxu1 %v412_v18  ;;  %v81_v41 = vld [vmem:[#allocation6 + $0x78] sm:$0xff]  ;;  %v424_v42 = vpack.c.bf16 %v172_v38, %v171_v37  ;;  %v174_v44 = vld [vmem:[#allocation8 + $0x68] sm:$0xff]  ;;  %v175_v48 = vld [vmem:[#allocation8 + $0x70] sm:$0xff] }
  0x41   :  { %414 = vmatprep.subr.bf16.mxu1 %v540_v0  ;;  %v406_v45 = vpack.c.bf16 %v81_v41, %v80_v40  ;;  %v427_v46 = vpack.c.bf16 %v174_v44, %v173_v43  ;;  %v65_v47 = vld [vmem:[#allocation3] sm:$0xff] }
  0x42   :  { %392 = vmatpush3.bf16.msra.mxu0 %v391_v14  ;;  %v176_v49 = vld [vmem:[#allocation8 + $0x78] sm:$0xff] }
  0x43   :  { %393 = vmatprep.subr.bf16.mxu0 %v540_v0  ;;  %v430_v50 = vpack.c.bf16 %v176_v49, %v175_v48  ;;  %v278_v51 = vld [vmem:[%s652_s2] ss:$0 sm:$0xff] }
  0x44   :  { %416 = vmatpush3.bf16.msra.mxu1 %v415_v24  ;;  %v279_v56 = vld [vmem:[%s654_s4] ss:$0 sm:$0xff] }
  0x45   :  { %417 = vmatprep.subr.bf16.mxu1 %v540_v0 }
  0x46   :  { %395 = vmatpush3.bf16.msra.mxu0 %v394_v21 }
  0x47   :  { %396 = vmatprep.subr.bf16.mxu0 %v540_v0 }
  0x48   :  { %419 = vmatpush3.bf16.msra.mxu1 %v418_v30 }
  0x49   :  { %420 = vmatprep.subr.bf16.mxu1 %v540_v0 }
  0x4a   :  { %398 = vmatpush3.bf16.msra.mxu0 %v397_v27 }
  0x4b   :  { %399 = vmatprep.subr.bf16.mxu0 %v540_v0 }
  0x4c   :  { %422 = vmatpush3.bf16.msra.mxu1 %v421_v36 }
  0x4d   :  { %423 = vmatprep.subr.bf16.mxu1 %v540_v0 }
  0x4e   :  { %401 = vmatpush3.bf16.msra.mxu0 %v400_v33 }
  0x4f   :  { %402 = vmatprep.subr.bf16.mxu0 %v540_v0 }
  0x50   :  { %425 = vmatpush3.bf16.msra.mxu1 %v424_v42 }
  0x51   :  { %426 = vmatprep.subr.bf16.mxu1 %v540_v0 }
  0x52   :  { %404 = vmatpush3.bf16.msra.mxu0 %v403_v39 }
  0x53   :  { %405 = vmatprep.subr.bf16.mxu0 %v540_v0 }
  0x54   :  { %428 = vmatpush3.bf16.msra.mxu1 %v427_v46 }
  0x55   :  { %429 = vmatprep.subr.bf16.mxu1 %v540_v0 }
  0x56   :  { %407 = vmatpush3.bf16.msra.mxu0 %v406_v45 }
  0x58   :  { %431 = vmatpush3.bf16.msra.mxu1 %v430_v50 }
  0x59   :  { %347 = vmatmul.mubr.f32.vlgmr.msra.gmra.mrb[0].mxu0 %v65_v47 }
 0x12c   :  { %v155_v52 = vpop.f32.mrb[0].mxu0 }
 0x12d   :  { %v156_v53 = vadd.f32 %v278_v51, %v155_v52  ;;  %v348_v54 = vpop.f32.mrb[1].mxu0 }
 0x12f   :  { %v159_v55 = vmax.f32 %v156_v53, 0.0 }
 0x131   :  { %382 = vmatmul.mubr.f32.vlgmr.msra.gmra.mrb[0].mxu1 %v159_v55 }
 0x204   :  { %v243_v57 = vpop.f32.mrb[0].mxu1 }
 0x205   :  { %v260_v58 = vadd.f32 %v279_v56, %v243_v57  ;;  %v383_v59 = vpop.f32.mrb[1].mxu1 }
 0x207   :  { %261 = vst [vmem:[#allocation9] sm:$0xff] %v260_v58 }
 0x208   :  { %518 = shalt.err (!%p515_p0)
}
 0x209   :  { %s519_s11 = scalar_lea.hbm %s655_s5, 128 }
 0x20a   :  { %p520_p1 = scmp.ne.s32.totalorder %s655_s5, %s519_s11  ;;  %p523_p2 = scmp.lt.u32.totalorder %s519_s11, %s655_s5 }
 0x20c   :  { %p525_p3 = pnand %p523_p2, %p520_p1 }
 0x20e   :  { %528 = shalt.err (!%p525_p3)
}
 0x20f   :  { %271 = dma.vmem_to_hbm [thread:$0]  %s269_s8, 128, %s655_s5, [#allocation5]  }
 0x210   :  { %533 = dma.done.wait [#allocation5], 128  }
 0x211   :  { %534 = vsyncadd [#allocation5], 4294967168 }
 0x212   :  { %275 = vsyncpa [#allocation4], 1 }
 0x213   :  { %276 = vsyncpa [#allocation7], 1 }
 0x214   :  { %277 = vsyncpa [#allocation5], 1 }

</bundles_post_ra>
